<compile_context>
chip_gen: v7x
topology: tpu7x:2x2x1
jax: 0.10.0
libtpu: 0.0.40
codegen_flags: <defaults>
</compile_context>

<pallas_src>
import functools

import jax
import jax.numpy as jnp
from jax.experimental import pallas as pl
from jax.experimental.pallas import tpu as pltpu

LANES = 128        # vreg lane width
SUBLANES = 8       # f32 vreg sublane height
BF16_ROWS = 16     # bf16 sublane packing: align slab sections to 16 rows


def _round_up(n, m):
    return ((n + m - 1) // m) * m


def _cdiv(a, b):
    return -(-a // b)


# ----------------------------------------------------------------------------
# Parameter packing: one pre-padded, 16-row / 128-lane aligned bf16 slab.
# ----------------------------------------------------------------------------
def pack_params(params):
    """Pack (w1,b1,w2,b2,w3,b3) into a single (rows, 128) bf16 slab + metadata."""
    w1, b1, w2, b2, w3, b3 = params
    input_size, hidden_size = w1.shape
    output_size = w3.shape[1]
    assert input_size <= LANES and hidden_size <= LANES and output_size <= LANES, (
        "This packing assumes in/hidden/out <= 128; generalize slab cols otherwise.")

    in_pad = _round_up(input_size, BF16_ROWS)     # x feature pad (and w1 rows)
    h_pad = LANES                                 # hidden padded to MXU width
    out_cols = _round_up(output_size, SUBLANES)   # narrow output slab width

    off_w1 = 0
    off_b1 = off_w1 + in_pad
    off_w2 = off_b1 + BF16_ROWS
    off_b2 = off_w2 + h_pad
    off_w3 = off_b2 + BF16_ROWS
    off_b3 = off_w3 + h_pad
    total_rows = off_b3 + BF16_ROWS

    def pad2(a, rows, cols):
        a = jnp.asarray(a, jnp.float32)
        a = jnp.pad(a, ((0, rows - a.shape[0]), (0, cols - a.shape[1])))
        return a.astype(jnp.bfloat16)

    slab = jnp.concatenate(
        [
            pad2(w1, in_pad, LANES),                     # rows [off_w1, off_b1)
            pad2(b1.reshape(1, -1), BF16_ROWS, LANES),   # bias in row off_b1
            pad2(w2, h_pad, LANES),
            pad2(b2.reshape(1, -1), BF16_ROWS, LANES),
            pad2(w3, h_pad, LANES),
            pad2(b3.reshape(1, -1), BF16_ROWS, LANES),
        ],
        axis=0,
    )

    meta = dict(
        input_size=input_size, hidden_size=hidden_size, output_size=output_size,
        in_pad=in_pad, h_pad=h_pad, out_cols=out_cols,
        off_w1=off_w1, off_b1=off_b1, off_w2=off_w2,
        off_b2=off_b2, off_w3=off_w3, off_b3=off_b3,
        total_rows=total_rows,
    )
    return slab, meta


# ----------------------------------------------------------------------------
# Kernel: one batch tile per grid step; the whole parameter slab is resident.
# ----------------------------------------------------------------------------
def _ppo_kernel(x_ref, p_ref, o_ref, *,
                in_pad, h_pad, out_valid, out_cols,
                off_w1, off_b1, off_w2, off_b2, off_w3, off_b3):
    # bf16 operands for the MXU; f32 accumulation and f32 VPU math everywhere.
    x = x_ref[...].astype(jnp.bfloat16)                     # (tile, in_pad)

    # Static, tile-aligned slices into the packed bf16 parameter slab.
    w1 = p_ref[pl.ds(off_w1, in_pad), :]                    # (in_pad, 128) bf16
    b1 = p_ref[pl.ds(off_b1, 1), :].astype(jnp.float32)     # (1, 128) f32
    w2 = p_ref[pl.ds(off_w2, h_pad), :]                     # (128, 128) bf16
    b2 = p_ref[pl.ds(off_b2, 1), :].astype(jnp.float32)
    w3 = p_ref[pl.ds(off_w3, h_pad), :]                     # (128, 128) bf16
    b3 = p_ref[pl.ds(off_b3, 1), :].astype(jnp.float32)

    # fc1 + relu (padded hidden lanes stay exactly 0: zero weights, zero bias)
    h1 = jnp.dot(x, w1, preferred_element_type=jnp.float32) + b1
    h1 = jnp.maximum(h1, 0.0)

    # fc2 + relu
    h2 = jnp.dot(h1.astype(jnp.bfloat16), w2,
                 preferred_element_type=jnp.float32) + b2
    h2 = jnp.maximum(h2, 0.0)

    # fc3 -> lane-padded logits (f32)
    logits = jnp.dot(h2.astype(jnp.bfloat16), w3,
                     preferred_element_type=jnp.float32) + b3

    # Mask padded output lanes so they contribute nothing to the softmax.
    lane = jax.lax.broadcasted_iota(jnp.int32, logits.shape, 1)
    logits = jnp.where(lane < out_valid, logits, -1e30)

    # Numerically stable softmax; exact divide so rows sum to 1.
    m = jnp.max(logits, axis=-1, keepdims=True)
    e = jnp.exp(logits - m)                                  # padded lanes -> 0
    s = jnp.sum(e, axis=-1, keepdims=True)
    probs = e[:, :out_cols] / s                              # narrow, exact
    o_ref[...] = probs.astype(o_ref.dtype)


# ----------------------------------------------------------------------------
# Wrapper: parallel batch grid, resident weights, narrow lane-dense output.
# ----------------------------------------------------------------------------
def _choose_tile(batch, batch_tile):
    """>=2 evenly sized grid steps when there is enough work (v7x 2 TCs)."""
    b8 = _round_up(batch, SUBLANES)
    if b8 <= 2 * SUBLANES:
        return b8                                    # tiny batch: single step
    n_steps = max(2, _cdiv(b8, batch_tile))
    return min(batch_tile, _round_up(_cdiv(b8, n_steps), SUBLANES))


def ppo_forward(x, slab, meta, *, batch_tile=4096):
    batch = x.shape[0]
    input_size = meta["input_size"]
    output_size = meta["output_size"]
    in_pad = meta["in_pad"]
    out_cols = meta["out_cols"]
    total_rows = meta["total_rows"]

    tile = _choose_tile(batch, batch_tile)
    batch_pad = _round_up(batch, tile)

    # TODO(synk): the feature pad (4 -> in_pad) could be done once at the data
    # producer; it is minor next to the (already shrunk) output writeback.
    x_pad = jnp.pad(jnp.asarray(x, jnp.float32),
                    ((0, batch_pad - batch), (0, in_pad - input_size)))

    kernel = functools.partial(
        _ppo_kernel,
        in_pad=in_pad, h_pad=meta["h_pad"],
        out_valid=output_size, out_cols=out_cols,
        off_w1=meta["off_w1"], off_b1=meta["off_b1"],
        off_w2=meta["off_w2"], off_b2=meta["off_b2"],
        off_w3=meta["off_w3"], off_b3=meta["off_b3"],
    )

    out = pl.pallas_call(
        kernel,
        out_shape=jax.ShapeDtypeStruct((batch_pad, out_cols), jnp.float32),
        grid=(batch_pad // tile,),
        in_specs=[
            pl.BlockSpec((tile, in_pad), lambda i: (i, 0)),        # batch tile
            pl.BlockSpec((total_rows, LANES), lambda i: (0, 0)),   # resident slab
        ],
        out_specs=pl.BlockSpec((tile, out_cols), lambda i: (i, 0)),
        compiler_params=pltpu.CompilerParams(
            dimension_semantics=("parallel",),        # megacore / v7x 2-TC split
            vmem_limit_bytes=32 * 1024 * 1024,        # safe on v7x's 64 MiB VMEM
        ),
    )(x_pad, slab)

    return out[:batch, :output_size]


# ----------------------------------------------------------------------------
# Deterministic init mirroring nn.Linear's U(-1/sqrt(fan_in), 1/sqrt(fan_in)).
# ----------------------------------------------------------------------------
def init_params(key, input_size, hidden_size, output_size):
    ks = jax.random.split(key, 6)

    def lin(kw, kb, fan_in, fan_out):
        bound = 1.0 / jnp.sqrt(jnp.float32(fan_in))
        w = jax.random.uniform(kw, (fan_in, fan_out), jnp.float32, -bound, bound)
        b = jax.random.uniform(kb, (1, fan_out), jnp.float32, -bound, bound)
        return w, b

    w1, b1 = lin(ks[0], ks[1], input_size, hidden_size)
    w2, b2 = lin(ks[2], ks[3], hidden_size, hidden_size)
    w3, b3 = lin(ks[4], ks[5], hidden_size, output_size)
    return (w1, b1, w2, b2, w3, b3)


def _reference(x, params):
    w1, b1, w2, b2, w3, b3 = params
    h = jnp.maximum(x @ w1 + b1, 0.0)
    h = jnp.maximum(h @ w2 + b2, 0.0)
    return jax.nn.softmax(h @ w3 + b3, axis=-1)


if __name__ == "__main__":
    # FlappyBirdEnvSimple-like sizes: small observation vector, 2 actions.
    input_size, hidden_size, output_size = 4, 32, 2
    batch = 8

    key = jax.random.PRNGKey(0)
    k_params, k_x, k_x2 = jax.random.split(key, 3)
    params = init_params(k_params, input_size, hidden_size, output_size)
    slab, meta = pack_params(params)          # pack once, reuse across calls

    fwd = jax.jit(lambda xx: ppo_forward(xx, slab, meta))

    # Small-batch check (single grid step).
    x = jax.random.normal(k_x, (batch, input_size), jnp.float32)
    probs = jax.block_until_ready(fwd(x))
    ref = _reference(x, params)
    assert probs.shape == (batch, output_size)
    # bf16 MXU operands vs f32 reference => ~1e-2 tolerance on probs.
    assert jnp.allclose(probs, ref, atol=2e-2, rtol=2e-2)
    # exact divide => rows sum to 1 within f32 rounding.
    assert jnp.allclose(jnp.sum(probs, axis=-1), 1.0, atol=1e-3)

    # Rollout-sized batch check (grid > 1: exercises the parallel batch axis,
    # the >=2-step split, and the batch/feature padding + slicing path).
    big_batch = 1000
    x_big = jax.random.normal(k_x2, (big_batch, input_size), jnp.float32)
    probs_big = jax.block_until_ready(fwd(x_big))
    ref_big = _reference(x_big, params)
    assert probs_big.shape == (big_batch, output_size)
    assert jnp.allclose(probs_big, ref_big, atol=2e-2, rtol=2e-2)
    assert jnp.allclose(jnp.sum(probs_big, axis=-1), 1.0, atol=1e-3)

    print("KERNEL_OK")
</pallas_src>

<mosaic_0001>
module attributes {stable_mosaic.version = 11 : i64} {
  func.func @_ppo_kernel(%arg0: i32, %arg1: memref<8x16xf32, #tpu.memory_space<vmem>>, %arg2: memref<320x128xbf16, #tpu.memory_space<vmem>>, %arg3: memref<8x8xf32, #tpu.memory_space<vmem>>) attributes {dimension_semantics = [#tpu.dimension_semantics<parallel>], iteration_bounds = array<i64: 1>, scalar_prefetch = 0 : i64, scratch_operands = 0 : i64, tpu.core_type = #tpu.core_type<tc>, window_params = [{transform_indices = @transform_0, window_bounds = array<i64: 8, 16>}, {pipeline_mode = #tpu.pipeline_mode<synchronous>, transform_indices = @transform_1, window_bounds = array<i64: 320, 128>}, {transform_indices = @transform_2, window_bounds = array<i64: 8, 8>}]} {
    %c0 = arith.constant 0 : index
    %c0_0 = arith.constant 0 : index
    %0 = vector.load %arg1[%c0, %c0_0] : memref<8x16xf32, #tpu.memory_space<vmem>>, vector<8x16xf32>
    %1 = arith.truncf %0 : vector<8x16xf32> to vector<8x16xbf16>
    %c0_1 = arith.constant 0 : index
    %c0_2 = arith.constant 0 : index
    %2 = vector.load %arg2[%c0_1, %c0_2] : memref<320x128xbf16, #tpu.memory_space<vmem>>, vector<16x128xbf16>
    %c16 = arith.constant 16 : index
    %c0_3 = arith.constant 0 : index
    %3 = vector.load %arg2[%c16, %c0_3] : memref<320x128xbf16, #tpu.memory_space<vmem>>, vector<1x128xbf16>
    %4 = arith.extf %3 : vector<1x128xbf16> to vector<1x128xf32>
    %c32 = arith.constant 32 : index
    %c0_4 = arith.constant 0 : index
    %5 = vector.load %arg2[%c32, %c0_4] : memref<320x128xbf16, #tpu.memory_space<vmem>>, vector<128x128xbf16>
    %c160 = arith.constant 160 : index
    %c0_5 = arith.constant 0 : index
    %6 = vector.load %arg2[%c160, %c0_5] : memref<320x128xbf16, #tpu.memory_space<vmem>>, vector<1x128xbf16>
    %7 = arith.extf %6 : vector<1x128xbf16> to vector<1x128xf32>
    %c176 = arith.constant 176 : index
    %c0_6 = arith.constant 0 : index
    %8 = vector.load %arg2[%c176, %c0_6] : memref<320x128xbf16, #tpu.memory_space<vmem>>, vector<128x128xbf16>
    %c304 = arith.constant 304 : index
    %c0_7 = arith.constant 0 : index
    %9 = vector.load %arg2[%c304, %c0_7] : memref<320x128xbf16, #tpu.memory_space<vmem>>, vector<1x128xbf16>
    %10 = arith.extf %9 : vector<1x128xbf16> to vector<1x128xf32>
    %cst = arith.constant dense<0.000000e+00> : vector<8x128xf32>
    %11 = tpu.matmul %1, %2, %cst {dimension_numbers = #tpu.dot_dimension_numbers<[1], [0], [0], [1], [0, 0, 1, 1], [], []>} : vector<8x16xbf16>, vector<16x128xbf16>, vector<8x128xf32> -> vector<8x128xf32>
    %12 = vector.broadcast %4 : vector<1x128xf32> to vector<8x128xf32>
    %13 = arith.addf %11, %12 : vector<8x128xf32>
    %cst_8 = arith.constant 0.000000e+00 : f32
    %14 = vector.broadcast %cst_8 : f32 to vector<8x128xf32>
    %15 = arith.maximumf %13, %14 : vector<8x128xf32>
    %16 = arith.truncf %15 : vector<8x128xf32> to vector<8x128xbf16>
    %cst_9 = arith.constant dense<0.000000e+00> : vector<8x128xf32>
    %17 = tpu.matmul %16, %5, %cst_9 {dimension_numbers = #tpu.dot_dimension_numbers<[1], [0], [0], [1], [0, 0, 1, 1], [], []>} : vector<8x128xbf16>, vector<128x128xbf16>, vector<8x128xf32> -> vector<8x128xf32>
    %18 = vector.broadcast %7 : vector<1x128xf32> to vector<8x128xf32>
    %19 = arith.addf %17, %18 : vector<8x128xf32>
    %cst_10 = arith.constant 0.000000e+00 : f32
    %20 = vector.broadcast %cst_10 : f32 to vector<8x128xf32>
    %21 = arith.maximumf %19, %20 : vector<8x128xf32>
    %22 = arith.truncf %21 : vector<8x128xf32> to vector<8x128xbf16>
    %cst_11 = arith.constant dense<0.000000e+00> : vector<8x128xf32>
    %23 = tpu.matmul %22, %8, %cst_11 {dimension_numbers = #tpu.dot_dimension_numbers<[1], [0], [0], [1], [0, 0, 1, 1], [], []>} : vector<8x128xbf16>, vector<128x128xbf16>, vector<8x128xf32> -> vector<8x128xf32>
    %24 = vector.broadcast %10 : vector<1x128xf32> to vector<8x128xf32>
    %25 = arith.addf %23, %24 : vector<8x128xf32>
    %26 = tpu.iota {dimensions = array<i32: 1>} : vector<8x128xi32>
    %c2_i32 = arith.constant 2 : i32
    %27 = vector.broadcast %c2_i32 : i32 to vector<8x128xi32>
    %28 = arith.cmpi slt, %26, %27 : vector<8x128xi32>
    %cst_12 = arith.constant -1.000000e+30 : f32
    %29 = vector.broadcast %cst_12 : f32 to vector<8x128xf32>
    %30 = arith.select %28, %25, %29 : vector<8x128xi1>, vector<8x128xf32>
    %cst_13 = arith.constant dense<0xFF800000> : vector<8xf32>
    %31 = vector.multi_reduction <maximumf>, %30, %cst_13 [1] : vector<8x128xf32> to vector<8xf32>
    %32 = vector.shape_cast %31 : vector<8xf32> to vector<8x1xf32>
    %33 = vector.broadcast %32 : vector<8x1xf32> to vector<8x128xf32>
    %34 = arith.subf %30, %33 : vector<8x128xf32>
    %35 = math.exp %34 : vector<8x128xf32>
    %cst_14 = arith.constant dense<0.000000e+00> : vector<8xf32>
    %36 = vector.multi_reduction <add>, %35, %cst_14 [1] : vector<8x128xf32> to vector<8xf32>
    %37 = vector.shape_cast %36 : vector<8xf32> to vector<8x1xf32>
    %38 = vector.extract_strided_slice %35 {offsets = [0, 0], sizes = [8, 8], strides = [1, 1]} : vector<8x128xf32> to vector<8x8xf32>
    %39 = vector.broadcast %37 : vector<8x1xf32> to vector<8x8xf32>
    %40 = arith.divf %38, %39 : vector<8x8xf32>
    %c0_15 = arith.constant 0 : index
    %c0_16 = arith.constant 0 : index
    %41 = vector.load %arg3[%c0_15, %c0_16] : memref<8x8xf32, #tpu.memory_space<vmem>>, vector<8x8xf32>
    tpu.vector_store %arg3[%c0_15, %c0_16], %40 {strides = array<i32>} : memref<8x8xf32, #tpu.memory_space<vmem>>, vector<8x8xf32>,
    return
  }
  func.func @transform_0(%arg0: i32) -> (i32, i32) {
    %c0_i32 = arith.constant 0 : i32
    %c0_i32_0 = arith.constant 0 : i32
    return %arg0, %c0_i32 : i32, i32
  }
  func.func @transform_1(%arg0: i32) -> (i32, i32) {
    %c0_i32 = arith.constant 0 : i32
    %c0_i32_0 = arith.constant 0 : i32
    %c0_i32_1 = arith.constant 0 : i32
    return %c0_i32, %c0_i32_0 : i32, i32
  }
  func.func @transform_2(%arg0: i32) -> (i32, i32) {
    %c0_i32 = arith.constant 0 : i32
    %c0_i32_0 = arith.constant 0 : i32
    return %arg0, %c0_i32 : i32, i32
  }
}

</mosaic_0001>

<bundles_post_ra>
// kernel: _lambda_.1
= control target key start
LH: loop header
LB: loop body
LE: loop exit
PB: predicated region body
PF: predicated region fallthrough
CT: control target
= control target key end

     0   :  { %7 = vsyncpa [#allocation3], 0  ;;  %s464_s9 = smov [#allocation2]   ;;  %s522_s0 = inlined_call_operand.vmem [shape: f32[8,16], index: 0, kind: input, shape index: {}]   ;;  %s523_s1 = inlined_call_operand.hbm [shape: bf16[320,128], index: 1, kind: input, shape index: {}]   ;;  %s524_s2 = inlined_call_operand.vmem [shape: f32[8,8], index: 2, kind: output, shape index: {}]  }
   0x1   :  { %s15_s10 = sshll.u32 %s464_s9, 4  ;;  %s440_s13 = scalar_lea.hbm %s523_s1, 2560  ;;  %s16_s10 = int_to_ptr.vmem [resolvable:$true] %s15_s10 }
   0x2   :  { %p441_p0 = scmp.ne.s32.totalorder %s523_s1, %s440_s13  ;;  %p444_p1 = scmp.lt.u32.totalorder %s440_s13, %s523_s1 }
   0x4   :  { %p446_p2 = pnand %p444_p1, %p441_p0 }
   0x6   :  { %449 = shalt.err (!%p446_p2)
}
   0x7   :  { %s450_s18 = scalar_lea.vmem %s16_s10, 2560  ;;  %p455_p4 = scmp.lt.s32.totalorder %s16_s10, %s16_s10 }
   0x8   :  { %p451_p3 = scmp.ne.s32.totalorder %s16_s10, %s450_s18  ;;  %p456_p5 = scmp.lt.s32.totalorder %s450_s18, %s450_s18 }
   0xa   :  { %p457_p6 = por %p456_p5, %p455_p4 }
   0xc   :  { %p458_p7 = pnand %p457_p6, %p451_p3 }
   0xe   :  { %461 = shalt.err (!%p458_p7)
}
   0xf   :  { %s465_s19 = smov 64   ;;  %s466_s20 = smov 4  }
  0x10   :  { %21 = dma.hbm_to_vmem [thread:$0]  %s523_s1, 2560, %s16_s10, [#allocation3], %s465_s19, %s465_s19, %s466_s20  }
  0x11   :  { %462 = dma.done.wait [#allocation3], 2560  }
  0x12   :  { %463 = vsyncadd [#allocation3], 4294964736  ;;  %v467_v0 = vmov 0.0   ;;  %vm468_vm0 = vmmov 0   ;;  %v419_v1 = vld [vmem:[#allocation2] sm:$0xff]   ;;  %vm78_vm1 = vcmask 130048   ;;  %v68_v18 = vlaneseq }
  0x13   :  { %368 = vmatprep.subr.bf16.mxu0 %v467_v0  ;;  %370 = vmatprep.mubr.msk.bf16.mxu0 %vm468_vm0, %v467_v0  ;;  %v26_v2 = vld [vmem:[%s522_s0] sm:$0xff]  ;;  %v420_v4 = vld [vmem:[#allocation2 + $0x10] sm:$0xff]   ;;  %v421_v5 = vld [vmem:[#allocation2 + $0x18] sm:$0xff]   ;;  %vm323_vm3 = vcmask 64512  }
  0x14   :  { %374 = vmatprep.subr.bf16.mxu1 %v467_v0  ;;  %390 = vmatprep.mubr.msk.bf16.mxu1 %vm468_vm0, %v467_v0  ;;  %v27_v3 = vpack.c.bf16 %v26_v2, %v26_v2  ;;  %v422_v6 = vld [vmem:[#allocation2 + $0x20] sm:$0xff]   ;;  %v423_v7 = vld [vmem:[#allocation2 + $0x28] sm:$0xff]   ;;  %v424_v8 = vld [vmem:[#allocation2 + $0x30] sm:$0xff]   ;;  %v69_v19 = vshrl.u32 %v68_v18, 7  ;;  %v311_v45 = vand.u32 127, %v68_v18 }
  0x15   :  { %369 = vmatpush3.bf16.msra.mxu0 %v419_v1  ;;  %375 = vmatpush3.bf16.msra.mxu1 %v420_v4  ;;  %v425_v9 = vld [vmem:[#allocation2 + $0x38] sm:$0xff]   ;;  %v426_v10 = vld [vmem:[#allocation2 + $0x40] sm:$0xff]   ;;  %v427_v11 = vld [vmem:[#allocation2 + $0x48] sm:$0xff]  }
  0x16   :  { %394 = vmatprep.subr.bf16.mxu0 %v467_v0  ;;  %376 = vmatprep.subr.bf16.mxu1 %v467_v0  ;;  %v428_v12 = vld [vmem:[#allocation2 + $0x58] sm:$0xff]   ;;  %v429_v13 = vld [vmem:[#allocation2 + $0x60] sm:$0xff]   ;;  %v430_v14 = vld [vmem:[#allocation2 + $0x68] sm:$0xff]   ;;  %v70_v22 = vsub.s32 0, %v69_v19  ;;  %vm312_vm2 = vcmp.lt.s32.totalorder %v311_v45, 2 }
  0x17   :  { %v431_v15 = vld [vmem:[#allocation2 + $0x70] sm:$0xff]   ;;  %v432_v16 = vld [vmem:[#allocation2 + $0x78] sm:$0xff]   ;;  %v433_v17 = vld [vmem:[#allocation2 + $0x80] sm:$0xff]  }
  0x18   :  { %371 = vmatmul.mubr.msk.bf16.vlgmr.msra.gmra.mrb[0].mxu0 %vm78_vm1, %v27_v3  ;;  %v30_v20 = vld [vmem:[#allocation2 + $0x8] sm:$0x1]  ;;  %v435_v32 = vld [vmem:[#allocation2 + $0x90] sm:$0xff]   ;;  %v66_v43 = vld [vmem:[#allocation2 + $0x98] sm:$0x1] }
  0x19   :  { %410 = vmatprep.mubr.msk.bf16.mxu0 %vm468_vm0, %v467_v0  ;;  %377 = vmatpush3.bf16.msra.mxu1 %v421_v5  ;;  %v31_v21 = vunpack.c.l.bf16 %v30_v20  ;;  %v434_v31 = vld [vmem:[#allocation2 + $0x88] sm:$0xff]   ;;  %v48_v33 = vld [vmem:[#allocation2 + $0x50] sm:$0x1]  ;;  %v67_v44 = vunpack.c.l.bf16 %v66_v43 }
  0x1a   :  { %378 = vmatprep.subr.bf16.mxu1 %v467_v0  ;;  %395 = vmatpush3.bf16.msra.mxu0 %v428_v12  ;;  %v49_v34 = vunpack.c.l.bf16 %v48_v33 }
  0x1b   :  { %396 = vmatprep.subr.bf16.mxu0 %v467_v0  ;;  %v71_v23 = vrot.slane %v31_v21, %v70_v22  ;;  %v221_v46 = vrot.slane %v67_v44, %v70_v22 }
  0x1c   :  { %v127_v35 = vrot.slane %v49_v34, %v70_v22 }
  0x1d   :  { %379 = vmatpush3.bf16.msra.mxu1 %v422_v6 }
  0x1e   :  { %380 = vmatprep.subr.bf16.mxu1 %v467_v0  ;;  %397 = vmatpush3.bf16.msra.mxu0 %v429_v13 }
  0x1f   :  { %398 = vmatprep.subr.bf16.mxu0 %v467_v0 }
  0x21   :  { %381 = vmatpush3.bf16.msra.mxu1 %v423_v7 }
  0x22   :  { %382 = vmatprep.subr.bf16.mxu1 %v467_v0  ;;  %399 = vmatpush3.bf16.msra.mxu0 %v430_v14 }
  0x23   :  { %400 = vmatprep.subr.bf16.mxu0 %v467_v0 }
  0x25   :  { %383 = vmatpush3.bf16.msra.mxu1 %v424_v8 }
  0x26   :  { %384 = vmatprep.subr.bf16.mxu1 %v467_v0  ;;  %401 = vmatpush3.bf16.msra.mxu0 %v431_v15 }
  0x27   :  { %402 = vmatprep.subr.bf16.mxu0 %v467_v0 }
  0x29   :  { %385 = vmatpush3.bf16.msra.mxu1 %v425_v9 }
  0x2a   :  { %386 = vmatprep.subr.bf16.mxu1 %v467_v0  ;;  %403 = vmatpush3.bf16.msra.mxu0 %v432_v16 }
  0x2b   :  { %404 = vmatprep.subr.bf16.mxu0 %v467_v0 }
  0x2d   :  { %387 = vmatpush3.bf16.msra.mxu1 %v426_v10 }
  0x2e   :  { %388 = vmatprep.subr.bf16.mxu1 %v467_v0  ;;  %405 = vmatpush3.bf16.msra.mxu0 %v433_v17 }
  0x2f   :  { %406 = vmatprep.subr.bf16.mxu0 %v467_v0 }
  0x31   :  { %389 = vmatpush3.bf16.msra.mxu1 %v427_v11 }
  0x32   :  { %407 = vmatpush3.bf16.msra.mxu0 %v434_v31 }
  0x33   :  { %408 = vmatprep.subr.bf16.mxu0 %v467_v0 }
  0x36   :  { %409 = vmatpush3.bf16.msra.mxu0 %v435_v32 }
  0xeb   :  { %v116_v24 = vpop.f32.mrb[0].mxu0 }
  0xec   :  { %v117_v25 = vadd.f32 %v116_v24, %v71_v23  ;;  %v372_v26 = vpop.f32.mrb[1].mxu0 }
  0xed   :  { %v119_v27 = vpop.f32.mrb[2].mxu0 }
  0xee   :  { %v122_v28 = vmax.f32 %v117_v25, 0.0  ;;  %v373_v29 = vpop.f32.mrb[3].mxu0 }
  0xf0   :  { %v123_v30 = vpack.c.bf16 %v122_v28, %v122_v28 }
  0xf2   :  { %391 = vmatmul.mubr.bf16.vlgmr.msra.gmra.mrb[0].mxu1 %v123_v30 }
 0x1c5   :  { %v210_v36 = vpop.f32.mrb[0].mxu1 }
 0x1c6   :  { %v211_v37 = vadd.f32 %v210_v36, %v127_v35  ;;  %v392_v38 = vpop.f32.mrb[1].mxu1 }
 0x1c7   :  { %v213_v39 = vpop.f32.mrb[2].mxu1 }
 0x1c8   :  { %v216_v40 = vmax.f32 %v211_v37, 0.0  ;;  %v393_v41 = vpop.f32.mrb[3].mxu1 }
 0x1ca   :  { %v217_v42 = vpack.c.bf16 %v216_v40, %v216_v40 }
 0x1cc   :  { %411 = vmatmul.mubr.bf16.vlgmr.msra.gmra.mrb[4].mxu0 %v217_v42 }
 0x29f   :  { %v304_v47 = vpop.f32.mrb[4].mxu0 }
 0x2a0   :  { %v305_v48 = vadd.f32 %v304_v47, %v221_v46  ;;  %v412_v49 = vpop.f32.mrb[5].mxu0 }
 0x2a1   :  { %v307_v50 = vpop.f32.mrb[6].mxu0 }
 0x2a2   :  { %v413_v51 = vpop.f32.mrb[7].mxu0  ;;  %v313_v52 = vsel %vm312_vm2, %v305_v48, -1e+30 }
 0x2a3   :  { %314 = vmax.xlane.f32.xlu0 %v313_v52 }
 0x330   :  { %v315_v53 = vpop.xlane.xlu0 %314 }
 0x331   :  { %v316_v54 = vsub.f32 %v313_v52, %v315_v53 }
 0x333   :  { %v317_v55 = vmul.f32 1.442695, %v316_v54 }
 0x335   :  { %436 = vpow2.f32 %v317_v55 }
 0x33f   :  { %v437_v56 = vpop.eup %436 }
 0x340   :  { %319 = vadd.xlane.f32.xlu0 %v437_v56 }
 0x3cd   :  { %v320_v57 = vpop.xlane.xlu0 %319 }
 0x3ce   :  { %438 = vrcp.f32 %v320_v57 }
 0x3d8   :  { %v439_v58 = vpop.eup %438 }
 0x3d9   :  { %v322_v59 = vmul.f32 %v439_v58, %v437_v56 }
 0x3db   :  { %324 = vst.msk [vmem:[%s524_s2] sm:$0xff] %vm323_vm3, %v322_v59 }
 0x3dc   :  { %329 = vsyncpa [#allocation3], 1 }

</bundles_post_ra>
